<compile_context>
chip_gen: v7x
topology: tpu7x:2x2x1
jax: 0.10.0
libtpu: 0.0.40
codegen_flags: <defaults>
</compile_context>

<pallas_src>
import functools

import jax
import jax.numpy as jnp
from jax import lax
from jax.experimental import pallas as pl
from jax.experimental.pallas import tpu as pltpu

LANE = 128


def _round_up(x, m):
    return ((x + m - 1) // m) * m


def no3_kernel(theta_ref, t_ref,
               w_in_ref, w_t_ref, b_in_ref,
               w_blk_ref, b_blk_ref,
               w_out_ref, b_out_ref,
               o_ref,
               *, depth, sigma, T, compute_dtype):
    """Fused MLP-ResNet forward + consistency skip combination (all dims pre-padded).

    theta_ref: (BM, dim_p)  f32            t_ref: (BM, 1) f32
    w_in:  (dim_p, width_p) compute_dtype  (main part of Linear(dim+1, width))
    w_t:   (1, width_p)     f32            (row of that Linear multiplying t)
    b_in:  (1, width_p)     f32
    w_blk: (depth, width_p, width_p) compute_dtype   b_blk: (depth, 1, width_p) f32
    w_out: (width_p, dim_p) compute_dtype             b_out: (1, dim_p) f32
    o_ref: (BM, dim_p) f32
    """
    theta = theta_ref[...]                      # (BM, dim_p) f32
    t = t_ref[...]                              # (BM, 1)     f32

    # input projection: theta @ W_main + t * w_t + b   (rank-1 term replaces the concat)
    h = jnp.dot(theta.astype(compute_dtype), w_in_ref[...],
                preferred_element_type=jnp.float32)
    h = h + t * w_t_ref[...] + b_in_ref[...]
    h = jnp.maximum(h, 0.0)

    # residual blocks (static unroll; fine for depth <= ~8, else switch to lax.fori_loop)
    for i in range(depth):
        z = jnp.dot(h.astype(compute_dtype), w_blk_ref[i],
                    preferred_element_type=jnp.float32) + b_blk_ref[i]
        h = h + jnp.maximum(z, 0.0)

    # output projection
    f_out = jnp.dot(h.astype(compute_dtype), w_out_ref[...],
                    preferred_element_type=jnp.float32) + b_out_ref[...]

    # consistency-model skip parameterization (EUP rsqrt; stable near t -> 0)
    ts = t * (1.0 / T)                          # (BM, 1)
    sig2 = sigma * sigma
    r = lax.rsqrt(sig2 + ts * ts)               # 1 / sqrt(sigma^2 + t^2)
    c_skip = (sig2 * r) * r                     # sigma^2 / (sigma^2 + t^2)
    c_out = sigma * jnp.abs(ts) * r             # sigma * |t| / sqrt(sigma^2 + t^2)
    o_ref[...] = theta * c_skip + f_out * c_out


def init_params(key, dim, width, depth, compute_dtype=jnp.bfloat16):
    """Deterministic parameter init (PyTorch-Linear-like uniform scaling).

    Weights are generated at the true (dim, width) shapes, then zero-padded once to
    lane-aligned shapes (multiples of 128).  Zero padding is exact: padded activation
    columns stay identically zero through the whole network and are sliced off.
    Matmul weights are stored in `compute_dtype` (bf16 by default) for the MXU;
    biases and the rank-1 t-row stay float32.
    """
    dim_p = _round_up(dim, LANE)
    width_p = _round_up(width, LANE)
    ks = jax.random.split(key, 6)

    def uni(k, shape, fan_in):
        bound = 1.0 / jnp.sqrt(jnp.float32(fan_in))
        return jax.random.uniform(k, shape, jnp.float32, -bound, bound)

    def pad2(a, r, c):
        return jnp.pad(a, ((0, r - a.shape[0]), (0, c - a.shape[1])))

    w_in_full = uni(ks[0], (dim + 1, width), dim + 1)    # mimics Linear(dim+1, width)
    w_blk = uni(ks[2], (depth, width, width), width)
    w_blk = jnp.pad(w_blk, ((0, 0), (0, width_p - width), (0, width_p - width)))
    b_blk = jnp.pad(uni(ks[3], (depth, 1, width), width),
                    ((0, 0), (0, 0), (0, width_p - width)))

    params = dict(
        w_in=pad2(w_in_full[:dim], dim_p, width_p).astype(compute_dtype),
        w_t=pad2(w_in_full[dim:dim + 1], 1, width_p),
        b_in=pad2(uni(ks[1], (1, width), dim + 1), 1, width_p),
        w_blk=w_blk.astype(compute_dtype),
        b_blk=b_blk,
        w_out=pad2(uni(ks[4], (width, dim), width), width_p, dim_p).astype(compute_dtype),
        b_out=pad2(uni(ks[5], (1, dim), width), 1, dim_p),
    )
    return params


def _tpu_vmem_and_cores():
    """Per-TensorCore VMEM capacity and (heuristic) TC count per chip."""
    try:
        info = pltpu.get_tpu_info()
        vmem = int(getattr(info, "vmem_capacity_bytes", 64 << 20))
    except Exception:
        vmem = 64 << 20          # conservative fallback (v7x per-TC)
    # v7x: 64 MiB/TC and 2 TensorCores; v5e/v6e: 128 MiB and 1 TensorCore.
    cores = 2 if vmem <= (64 << 20) else 1
    return vmem, cores


def no3_forward(theta, t, params, *, depth, sigma=0.5, T=0.1, batch_tile=None):
    """Reproduces NO3.forward. theta: (bs, dim) or (nt, bs, dim); t: (bs,) or (nt, bs)."""
    input_shape = theta.shape
    theta2 = theta.reshape(-1, theta.shape[-1]).astype(jnp.float32)
    t2 = t.reshape(-1, 1).astype(jnp.float32)

    B, dim = theta2.shape
    dim_p, width_p = params["w_in"].shape
    depth_p = params["w_blk"].shape[0]
    assert depth_p == depth
    compute_dtype = params["w_in"].dtype
    itemsize = jnp.dtype(compute_dtype).itemsize

    vmem_cap, num_tc = _tpu_vmem_and_cores()
    # Never request the entire physical VMEM: keep headroom for Mosaic internal scratch.
    vmem_ceiling = max(int(min(vmem_cap - (8 << 20), 100 << 20)), 32 << 20)

    # Pad feature columns to the lane-aligned width used by the weights (zero columns).
    if dim_p != dim:
        theta2 = jnp.pad(theta2, ((0, 0), (0, dim_p - dim)))

    # grid-invariant (single-buffered) weight/bias footprint
    w_bytes = (params["w_in"].size + params["w_blk"].size + params["w_out"].size) * itemsize
    b_bytes = (params["w_t"].size + params["b_in"].size
               + params["b_blk"].size + params["b_out"].size) * 4

    if batch_tile is None:
        batch_tile = 512 if vmem_cap > (96 << 20) else 256

    def vmem_estimate(bm):
        io = 2 * (2 * bm * dim_p * 4 + bm * 4)                       # theta/out/t, 2-buffered
        act = bm * width_p * (3 * 4 + 2 * itemsize) + bm * dim_p * 4  # h, z, casts, f_out
        return w_bytes + b_bytes + io + act + (4 << 20)

    # Adaptive batch tile: largest tile that fits the VMEM ceiling; tiny batches aren't
    # padded to hundreds of dead rows.  Only force >= 2 grid steps on 2-TC chips (v7x),
    # where dimension_semantics=("parallel",) shards the batch grid across the cores.
    B8 = _round_up(B, 8)
    BM = min(batch_tile, B8)
    while BM > 8 and vmem_estimate(BM) > vmem_ceiling:
        BM = _round_up(BM // 2, 8)
    if num_tc >= 2 and B8 // BM < 2 and B8 >= 16:
        BM = _round_up(pl.cdiv(B8, 2), 8)
    B_pad = _round_up(B8, BM)
    if B_pad != B:
        theta2 = jnp.pad(theta2, ((0, B_pad - B), (0, 0)))
        t2 = jnp.pad(t2, ((0, B_pad - B), (0, 0)))

    grid = (B_pad // BM,)
    vmem_limit = int(min(max(vmem_estimate(BM), 32 << 20), vmem_ceiling))
    kernel = functools.partial(no3_kernel, depth=depth, sigma=sigma, T=T,
                               compute_dtype=compute_dtype)

    def run(single_buffer_weights):
        if single_buffer_weights:
            def wspec(shape, imap):
                return pl.BlockSpec(shape, imap, pipeline_mode=pl.Buffered(1))
        else:
            def wspec(shape, imap):
                return pl.BlockSpec(shape, imap)

        return pl.pallas_call(
            kernel,
            out_shape=jax.ShapeDtypeStruct((B_pad, dim_p), jnp.float32),
            grid_spec=pltpu.PrefetchScalarGridSpec(
                num_scalar_prefetch=0,
                grid=grid,
                in_specs=[
                    pl.BlockSpec((BM, dim_p), lambda i: (i, 0)),              # theta
                    pl.BlockSpec((BM, 1), lambda i: (i, 0)),                  # t
                    wspec((dim_p, width_p), lambda i: (0, 0)),                # w_in (main)
                    wspec((1, width_p), lambda i: (0, 0)),                    # w_t (rank-1)
                    wspec((1, width_p), lambda i: (0, 0)),                    # b_in
                    wspec((depth, width_p, width_p), lambda i: (0, 0, 0)),    # w_blk
                    wspec((depth, 1, width_p), lambda i: (0, 0, 0)),          # b_blk
                    wspec((width_p, dim_p), lambda i: (0, 0)),                # w_out
                    wspec((1, dim_p), lambda i: (0, 0)),                      # b_out
                ],
                out_specs=pl.BlockSpec((BM, dim_p), lambda i: (i, 0)),
            ),
            compiler_params=pltpu.CompilerParams(
                dimension_semantics=("parallel",),
                vmem_limit_bytes=vmem_limit),
        )(theta2, t2,
          params["w_in"], params["w_t"], params["b_in"],
          params["w_blk"], params["b_blk"],
          params["w_out"], params["b_out"])

    try:
        out = run(True)
    except Exception:
        # Fallback if Buffered(1) pipeline mode is rejected by this jax/Mosaic build.
        out = run(False)

    out = out[:B, :dim]     # drop zero-padded rows/columns
    return out.reshape(input_shape)


def no3_reference(theta, t, params, *, depth, sigma=0.5, T=0.1):
    """Pure-JAX reference (same bf16-matmul / f32-accumulate semantics as the kernel)."""
    input_shape = theta.shape
    theta2 = theta.reshape(-1, theta.shape[-1]).astype(jnp.float32)
    t2 = t.reshape(-1, 1).astype(jnp.float32)
    dim = theta2.shape[1]
    dim_p = params["w_in"].shape[0]
    cdt = params["w_in"].dtype
    theta_p = jnp.pad(theta2, ((0, 0), (0, dim_p - dim)))

    h = jnp.dot(theta_p.astype(cdt), params["w_in"], preferred_element_type=jnp.float32)
    h = h + t2 * params["w_t"] + params["b_in"]
    h = jnp.maximum(h, 0.0)
    for i in range(depth):
        z = jnp.dot(h.astype(cdt), params["w_blk"][i],
                    preferred_element_type=jnp.float32) + params["b_blk"][i]
        h = h + jnp.maximum(z, 0.0)
    f_out = jnp.dot(h.astype(cdt), params["w_out"],
                    preferred_element_type=jnp.float32) + params["b_out"]

    ts = t2 / T
    c_skip = sigma ** 2 / (sigma ** 2 + ts ** 2)
    c_out = jnp.sqrt(1.0 - c_skip) * sigma        # torch formulation
    out = theta_p * c_skip + f_out * c_out
    return out[:, :dim].reshape(input_shape)


if __name__ == "__main__":
    # small, forward-consistent shapes (real module: dim=970, width=1000, depth=5)
    dim, width, depth = 32, 64, 3
    sigma, T = 0.5, 0.1
    nt, bs = 2, 4

    key = jax.random.PRNGKey(0)
    k_theta, k_t, k_params = jax.random.split(key, 3)

    theta = jax.random.normal(k_theta, (nt, bs, dim), jnp.float32)
    t = jax.random.uniform(k_t, (nt, bs), jnp.float32) * T

    params = init_params(k_params, dim, width, depth)

    out = no3_forward(theta, t, params, depth=depth, sigma=sigma, T=T)
    out = jax.block_until_ready(out)

    ref = no3_reference(theta, t, params, depth=depth, sigma=sigma, T=T)
    assert out.shape == theta.shape
    assert jnp.allclose(out, ref, atol=2e-3, rtol=2e-3), "mismatch vs reference"

    print("KERNEL_OK")
</pallas_src>

<mosaic_0001>
module attributes {stable_mosaic.version = 11 : i64} {
  func.func @no3_kernel(%arg0: i32, %arg1: memref<8x128xf32, #tpu.memory_space<vmem>>, %arg2: memref<8x1xf32, #tpu.memory_space<vmem>>, %arg3: memref<128x128xbf16, #tpu.memory_space<vmem>>, %arg4: memref<1x128xf32, #tpu.memory_space<vmem>>, %arg5: memref<1x128xf32, #tpu.memory_space<vmem>>, %arg6: memref<3x128x128xbf16, #tpu.memory_space<vmem>>, %arg7: memref<3x1x128xf32, #tpu.memory_space<vmem>>, %arg8: memref<128x128xbf16, #tpu.memory_space<vmem>>, %arg9: memref<1x128xf32, #tpu.memory_space<vmem>>, %arg10: memref<8x128xf32, #tpu.memory_space<vmem>>) attributes {dimension_semantics = [#tpu.dimension_semantics<parallel>], iteration_bounds = array<i64: 1>, scalar_prefetch = 0 : i64, scratch_operands = 0 : i64, tpu.core_type = #tpu.core_type<tc>, window_params = [{transform_indices = @transform_0, window_bounds = array<i64: 8, 128>}, {transform_indices = @transform_1, window_bounds = array<i64: 8, 1>}, {pipeline_mode = #tpu.pipeline_mode<synchronous>, transform_indices = @transform_2, window_bounds = array<i64: 128, 128>}, {pipeline_mode = #tpu.pipeline_mode<synchronous>, transform_indices = @transform_3, window_bounds = array<i64: 1, 128>}, {pipeline_mode = #tpu.pipeline_mode<synchronous>, transform_indices = @transform_4, window_bounds = array<i64: 1, 128>}, {pipeline_mode = #tpu.pipeline_mode<synchronous>, transform_indices = @transform_5, window_bounds = array<i64: 3, 128, 128>}, {pipeline_mode = #tpu.pipeline_mode<synchronous>, transform_indices = @transform_6, window_bounds = array<i64: 3, 1, 128>}, {pipeline_mode = #tpu.pipeline_mode<synchronous>, transform_indices = @transform_7, window_bounds = array<i64: 128, 128>}, {pipeline_mode = #tpu.pipeline_mode<synchronous>, transform_indices = @transform_8, window_bounds = array<i64: 1, 128>}, {transform_indices = @transform_9, window_bounds = array<i64: 8, 128>}]} {
    %c0 = arith.constant 0 : index
    %c0_0 = arith.constant 0 : index
    %0 = vector.load %arg1[%c0, %c0_0] : memref<8x128xf32, #tpu.memory_space<vmem>>, vector<8x128xf32>
    %c0_1 = arith.constant 0 : index
    %c0_2 = arith.constant 0 : index
    %1 = vector.load %arg2[%c0_1, %c0_2] : memref<8x1xf32, #tpu.memory_space<vmem>>, vector<8x1xf32>
    %2 = arith.truncf %0 : vector<8x128xf32> to vector<8x128xbf16>
    %c0_3 = arith.constant 0 : index
    %c0_4 = arith.constant 0 : index
    %3 = vector.load %arg3[%c0_3, %c0_4] : memref<128x128xbf16, #tpu.memory_space<vmem>>, vector<128x128xbf16>
    %cst = arith.constant dense<0.000000e+00> : vector<8x128xf32>
    %4 = tpu.matmul %2, %3, %cst {dimension_numbers = #tpu.dot_dimension_numbers<[1], [0], [0], [1], [0, 0, 1, 1], [], []>} : vector<8x128xbf16>, vector<128x128xbf16>, vector<8x128xf32> -> vector<8x128xf32>
    %c0_5 = arith.constant 0 : index
    %c0_6 = arith.constant 0 : index
    %5 = vector.load %arg4[%c0_5, %c0_6] : memref<1x128xf32, #tpu.memory_space<vmem>>, vector<1x128xf32>
    %6 = vector.broadcast %1 : vector<8x1xf32> to vector<8x128xf32>
    %7 = vector.broadcast %5 : vector<1x128xf32> to vector<8x128xf32>
    %8 = arith.mulf %6, %7 : vector<8x128xf32>
    %9 = arith.addf %4, %8 : vector<8x128xf32>
    %c0_7 = arith.constant 0 : index
    %c0_8 = arith.constant 0 : index
    %10 = vector.load %arg5[%c0_7, %c0_8] : memref<1x128xf32, #tpu.memory_space<vmem>>, vector<1x128xf32>
    %11 = vector.broadcast %10 : vector<1x128xf32> to vector<8x128xf32>
    %12 = arith.addf %9, %11 : vector<8x128xf32>
    %cst_9 = arith.constant 0.000000e+00 : f32
    %13 = vector.broadcast %cst_9 : f32 to vector<8x128xf32>
    %14 = arith.maximumf %12, %13 : vector<8x128xf32>
    %15 = arith.truncf %14 : vector<8x128xf32> to vector<8x128xbf16>
    %c0_10 = arith.constant 0 : index
    %c0_11 = arith.constant 0 : index
    %c0_12 = arith.constant 0 : index
    %16 = vector.load %arg6[%c0_10, %c0_11, %c0_12] : memref<3x128x128xbf16, #tpu.memory_space<vmem>>, vector<1x128x128xbf16>
    %17 = vector.shape_cast %16 : vector<1x128x128xbf16> to vector<128x128xbf16>
    %cst_13 = arith.constant dense<0.000000e+00> : vector<8x128xf32>
    %18 = tpu.matmul %15, %17, %cst_13 {dimension_numbers = #tpu.dot_dimension_numbers<[1], [0], [0], [1], [0, 0, 1, 1], [], []>} : vector<8x128xbf16>, vector<128x128xbf16>, vector<8x128xf32> -> vector<8x128xf32>
    %c0_14 = arith.constant 0 : index
    %c0_15 = arith.constant 0 : index
    %c0_16 = arith.constant 0 : index
    %19 = vector.load %arg7[%c0_14, %c0_15, %c0_16] : memref<3x1x128xf32, #tpu.memory_space<vmem>>, vector<1x1x128xf32>
    %20 = vector.shape_cast %19 : vector<1x1x128xf32> to vector<1x128xf32>
    %21 = vector.broadcast %20 : vector<1x128xf32> to vector<8x128xf32>
    %22 = arith.addf %18, %21 : vector<8x128xf32>
    %cst_17 = arith.constant 0.000000e+00 : f32
    %23 = vector.broadcast %cst_17 : f32 to vector<8x128xf32>
    %24 = arith.maximumf %22, %23 : vector<8x128xf32>
    %25 = arith.addf %14, %24 : vector<8x128xf32>
    %26 = arith.truncf %25 : vector<8x128xf32> to vector<8x128xbf16>
    %c1 = arith.constant 1 : index
    %c0_18 = arith.constant 0 : index
    %c0_19 = arith.constant 0 : index
    %27 = vector.load %arg6[%c1, %c0_18, %c0_19] : memref<3x128x128xbf16, #tpu.memory_space<vmem>>, vector<1x128x128xbf16>
    %28 = vector.shape_cast %27 : vector<1x128x128xbf16> to vector<128x128xbf16>
    %cst_20 = arith.constant dense<0.000000e+00> : vector<8x128xf32>
    %29 = tpu.matmul %26, %28, %cst_20 {dimension_numbers = #tpu.dot_dimension_numbers<[1], [0], [0], [1], [0, 0, 1, 1], [], []>} : vector<8x128xbf16>, vector<128x128xbf16>, vector<8x128xf32> -> vector<8x128xf32>
    %c1_21 = arith.constant 1 : index
    %c0_22 = arith.constant 0 : index
    %c0_23 = arith.constant 0 : index
    %30 = vector.load %arg7[%c1_21, %c0_22, %c0_23] : memref<3x1x128xf32, #tpu.memory_space<vmem>>, vector<1x1x128xf32>
    %31 = vector.shape_cast %30 : vector<1x1x128xf32> to vector<1x128xf32>
    %32 = vector.broadcast %31 : vector<1x128xf32> to vector<8x128xf32>
    %33 = arith.addf %29, %32 : vector<8x128xf32>
    %cst_24 = arith.constant 0.000000e+00 : f32
    %34 = vector.broadcast %cst_24 : f32 to vector<8x128xf32>
    %35 = arith.maximumf %33, %34 : vector<8x128xf32>
    %36 = arith.addf %25, %35 : vector<8x128xf32>
    %37 = arith.truncf %36 : vector<8x128xf32> to vector<8x128xbf16>
    %c2 = arith.constant 2 : index
    %c0_25 = arith.constant 0 : index
    %c0_26 = arith.constant 0 : index
    %38 = vector.load %arg6[%c2, %c0_25, %c0_26] : memref<3x128x128xbf16, #tpu.memory_space<vmem>>, vector<1x128x128xbf16>
    %39 = vector.shape_cast %38 : vector<1x128x128xbf16> to vector<128x128xbf16>
    %cst_27 = arith.constant dense<0.000000e+00> : vector<8x128xf32>
    %40 = tpu.matmul %37, %39, %cst_27 {dimension_numbers = #tpu.dot_dimension_numbers<[1], [0], [0], [1], [0, 0, 1, 1], [], []>} : vector<8x128xbf16>, vector<128x128xbf16>, vector<8x128xf32> -> vector<8x128xf32>
    %c2_28 = arith.constant 2 : index
    %c0_29 = arith.constant 0 : index
    %c0_30 = arith.constant 0 : index
    %41 = vector.load %arg7[%c2_28, %c0_29, %c0_30] : memref<3x1x128xf32, #tpu.memory_space<vmem>>, vector<1x1x128xf32>
    %42 = vector.shape_cast %41 : vector<1x1x128xf32> to vector<1x128xf32>
    %43 = vector.broadcast %42 : vector<1x128xf32> to vector<8x128xf32>
    %44 = arith.addf %40, %43 : vector<8x128xf32>
    %cst_31 = arith.constant 0.000000e+00 : f32
    %45 = vector.broadcast %cst_31 : f32 to vector<8x128xf32>
    %46 = arith.maximumf %44, %45 : vector<8x128xf32>
    %47 = arith.addf %36, %46 : vector<8x128xf32>
    %48 = arith.truncf %47 : vector<8x128xf32> to vector<8x128xbf16>
    %c0_32 = arith.constant 0 : index
    %c0_33 = arith.constant 0 : index
    %49 = vector.load %arg8[%c0_32, %c0_33] : memref<128x128xbf16, #tpu.memory_space<vmem>>, vector<128x128xbf16>
    %cst_34 = arith.constant dense<0.000000e+00> : vector<8x128xf32>
    %50 = tpu.matmul %48, %49, %cst_34 {dimension_numbers = #tpu.dot_dimension_numbers<[1], [0], [0], [1], [0, 0, 1, 1], [], []>} : vector<8x128xbf16>, vector<128x128xbf16>, vector<8x128xf32> -> vector<8x128xf32>
    %c0_35 = arith.constant 0 : index
    %c0_36 = arith.constant 0 : index
    %51 = vector.load %arg9[%c0_35, %c0_36] : memref<1x128xf32, #tpu.memory_space<vmem>>, vector<1x128xf32>
    %52 = vector.broadcast %51 : vector<1x128xf32> to vector<8x128xf32>
    %53 = arith.addf %50, %52 : vector<8x128xf32>
    %cst_37 = arith.constant 1.000000e+01 : f32
    %54 = vector.broadcast %cst_37 : f32 to vector<8x1xf32>
    %55 = arith.mulf %1, %54 : vector<8x1xf32>
    %56 = arith.mulf %55, %55 : vector<8x1xf32>
    %cst_38 = arith.constant 2.500000e-01 : f32
    %57 = vector.broadcast %cst_38 : f32 to vector<8x1xf32>
    %58 = arith.addf %57, %56 : vector<8x1xf32>
    %59 = math.rsqrt %58 : vector<8x1xf32>
    %cst_39 = arith.constant 2.500000e-01 : f32
    %60 = vector.broadcast %cst_39 : f32 to vector<8x1xf32>
    %61 = arith.mulf %60, %59 : vector<8x1xf32>
    %62 = arith.mulf %61, %59 : vector<8x1xf32>
    %63 = math.absf %55 : vector<8x1xf32>
    %cst_40 = arith.constant 5.000000e-01 : f32
    %64 = vector.broadcast %cst_40 : f32 to vector<8x1xf32>
    %65 = arith.mulf %64, %63 : vector<8x1xf32>
    %66 = arith.mulf %65, %59 : vector<8x1xf32>
    %67 = vector.broadcast %62 : vector<8x1xf32> to vector<8x128xf32>
    %68 = arith.mulf %0, %67 : vector<8x128xf32>
    %69 = vector.broadcast %66 : vector<8x1xf32> to vector<8x128xf32>
    %70 = arith.mulf %53, %69 : vector<8x128xf32>
    %71 = arith.addf %68, %70 : vector<8x128xf32>
    %c0_41 = arith.constant 0 : index
    %c0_42 = arith.constant 0 : index
    %72 = vector.load %arg10[%c0_41, %c0_42] : memref<8x128xf32, #tpu.memory_space<vmem>>, vector<8x128xf32>
    tpu.vector_store %arg10[%c0_41, %c0_42], %71 {strides = array<i32>} : memref<8x128xf32, #tpu.memory_space<vmem>>, vector<8x128xf32>,
    return
  }
  func.func @transform_0(%arg0: i32) -> (i32, i32) {
    %c0_i32 = arith.constant 0 : i32
    %c0_i32_0 = arith.constant 0 : i32
    return %arg0, %c0_i32 : i32, i32
  }
  func.func @transform_1(%arg0: i32) -> (i32, i32) {
    %c0_i32 = arith.constant 0 : i32
    %c0_i32_0 = arith.constant 0 : i32
    return %arg0, %c0_i32 : i32, i32
  }
  func.func @transform_2(%arg0: i32) -> (i32, i32) {
    %c0_i32 = arith.constant 0 : i32
    %c0_i32_0 = arith.constant 0 : i32
    %c0_i32_1 = arith.constant 0 : i32
    return %c0_i32, %c0_i32_0 : i32, i32
  }
  func.func @transform_3(%arg0: i32) -> (i32, i32) {
    %c0_i32 = arith.constant 0 : i32
    %c0_i32_0 = arith.constant 0 : i32
    %c0_i32_1 = arith.constant 0 : i32
    return %c0_i32, %c0_i32_0 : i32, i32
  }
  func.func @transform_4(%arg0: i32) -> (i32, i32) {
    %c0_i32 = arith.constant 0 : i32
    %c0_i32_0 = arith.constant 0 : i32
    %c0_i32_1 = arith.constant 0 : i32
    return %c0_i32, %c0_i32_0 : i32, i32
  }
  func.func @transform_5(%arg0: i32) -> (i32, i32, i32) {
    %c0_i32 = arith.constant 0 : i32
    %c0_i32_0 = arith.constant 0 : i32
    %c0_i32_1 = arith.constant 0 : i32
    %c0_i32_2 = arith.constant 0 : i32
    return %c0_i32, %c0_i32_0, %c0_i32_1 : i32, i32, i32
  }
  func.func @transform_6(%arg0: i32) -> (i32, i32, i32) {
    %c0_i32 = arith.constant 0 : i32
    %c0_i32_0 = arith.constant 0 : i32
    %c0_i32_1 = arith.constant 0 : i32
    %c0_i32_2 = arith.constant 0 : i32
    return %c0_i32, %c0_i32_0, %c0_i32_1 : i32, i32, i32
  }
  func.func @transform_7(%arg0: i32) -> (i32, i32) {
    %c0_i32 = arith.constant 0 : i32
    %c0_i32_0 = arith.constant 0 : i32
    %c0_i32_1 = arith.constant 0 : i32
    return %c0_i32, %c0_i32_0 : i32, i32
  }
  func.func @transform_8(%arg0: i32) -> (i32, i32) {
    %c0_i32 = arith.constant 0 : i32
    %c0_i32_0 = arith.constant 0 : i32
    %c0_i32_1 = arith.constant 0 : i32
    return %c0_i32, %c0_i32_0 : i32, i32
  }
  func.func @transform_9(%arg0: i32) -> (i32, i32) {
    %c0_i32 = arith.constant 0 : i32
    %c0_i32_0 = arith.constant 0 : i32
    return %arg0, %c0_i32 : i32, i32
  }
}

module attributes {stable_mosaic.version = 11 : i64} {
  func.func @no3_kernel(%arg0: i32, %arg1: memref<8x128xf32, #tpu.memory_space<vmem>>, %arg2: memref<8x1xf32, #tpu.memory_space<vmem>>, %arg3: memref<128x128xbf16, #tpu.memory_space<vmem>>, %arg4: memref<1x128xf32, #tpu.memory_space<vmem>>, %arg5: memref<1x128xf32, #tpu.memory_space<vmem>>, %arg6: memref<3x128x128xbf16, #tpu.memory_space<vmem>>, %arg7: memref<3x1x128xf32, #tpu.memory_space<vmem>>, %arg8: memref<128x128xbf16, #tpu.memory_space<vmem>>, %arg9: memref<1x128xf32, #tpu.memory_space<vmem>>, %arg10: memref<8x128xf32, #tpu.memory_space<vmem>>) attributes {dimension_semantics = [#tpu.dimension_semantics<parallel>], iteration_bounds = array<i64: 1>, scalar_prefetch = 0 : i64, scratch_operands = 0 : i64, tpu.core_type = #tpu.core_type<tc>, window_params = [{transform_indices = @transform_0, window_bounds = array<i64: 8, 128>}, {transform_indices = @transform_1, window_bounds = array<i64: 8, 1>}, {pipeline_mode = #tpu.pipeline_mode<synchronous>, transform_indices = @transform_2, window_bounds = array<i64: 128, 128>}, {pipeline_mode = #tpu.pipeline_mode<synchronous>, transform_indices = @transform_3, window_bounds = array<i64: 1, 128>}, {pipeline_mode = #tpu.pipeline_mode<synchronous>, transform_indices = @transform_4, window_bounds = array<i64: 1, 128>}, {pipeline_mode = #tpu.pipeline_mode<synchronous>, transform_indices = @transform_5, window_bounds = array<i64: 3, 128, 128>}, {pipeline_mode = #tpu.pipeline_mode<synchronous>, transform_indices = @transform_6, window_bounds = array<i64: 3, 1, 128>}, {pipeline_mode = #tpu.pipeline_mode<synchronous>, transform_indices = @transform_7, window_bounds = array<i64: 128, 128>}, {pipeline_mode = #tpu.pipeline_mode<synchronous>, transform_indices = @transform_8, window_bounds = array<i64: 1, 128>}, {transform_indices = @transform_9, window_bounds = array<i64: 8, 128>}]} {
    %c0 = arith.constant 0 : index
    %c0_0 = arith.constant 0 : index
    %0 = vector.load %arg1[%c0, %c0_0] : memref<8x128xf32, #tpu.memory_space<vmem>>, vector<8x128xf32>
    %c0_1 = arith.constant 0 : index
    %c0_2 = arith.constant 0 : index
    %1 = vector.load %arg2[%c0_1, %c0_2] : memref<8x1xf32, #tpu.memory_space<vmem>>, vector<8x1xf32>
    %2 = arith.truncf %0 : vector<8x128xf32> to vector<8x128xbf16>
    %c0_3 = arith.constant 0 : index
    %c0_4 = arith.constant 0 : index
    %3 = vector.load %arg3[%c0_3, %c0_4] : memref<128x128xbf16, #tpu.memory_space<vmem>>, vector<128x128xbf16>
    %cst = arith.constant dense<0.000000e+00> : vector<8x128xf32>
    %4 = tpu.matmul %2, %3, %cst {dimension_numbers = #tpu.dot_dimension_numbers<[1], [0], [0], [1], [0, 0, 1, 1], [], []>} : vector<8x128xbf16>, vector<128x128xbf16>, vector<8x128xf32> -> vector<8x128xf32>
    %c0_5 = arith.constant 0 : index
    %c0_6 = arith.constant 0 : index
    %5 = vector.load %arg4[%c0_5, %c0_6] : memref<1x128xf32, #tpu.memory_space<vmem>>, vector<1x128xf32>
    %6 = vector.broadcast %1 : vector<8x1xf32> to vector<8x128xf32>
    %7 = vector.broadcast %5 : vector<1x128xf32> to vector<8x128xf32>
    %8 = arith.mulf %6, %7 : vector<8x128xf32>
    %9 = arith.addf %4, %8 : vector<8x128xf32>
    %c0_7 = arith.constant 0 : index
    %c0_8 = arith.constant 0 : index
    %10 = vector.load %arg5[%c0_7, %c0_8] : memref<1x128xf32, #tpu.memory_space<vmem>>, vector<1x128xf32>
    %11 = vector.broadcast %10 : vector<1x128xf32> to vector<8x128xf32>
    %12 = arith.addf %9, %11 : vector<8x128xf32>
    %cst_9 = arith.constant 0.000000e+00 : f32
    %13 = vector.broadcast %cst_9 : f32 to vector<8x128xf32>
    %14 = arith.maximumf %12, %13 : vector<8x128xf32>
    %15 = arith.truncf %14 : vector<8x128xf32> to vector<8x128xbf16>
    %c0_10 = arith.constant 0 : index
    %c0_11 = arith.constant 0 : index
    %c0_12 = arith.constant 0 : index
    %16 = vector.load %arg6[%c0_10, %c0_11, %c0_12] : memref<3x128x128xbf16, #tpu.memory_space<vmem>>, vector<1x128x128xbf16>
    %17 = vector.shape_cast %16 : vector<1x128x128xbf16> to vector<128x128xbf16>
    %cst_13 = arith.constant dense<0.000000e+00> : vector<8x128xf32>
    %18 = tpu.matmul %15, %17, %cst_13 {dimension_numbers = #tpu.dot_dimension_numbers<[1], [0], [0], [1], [0, 0, 1, 1], [], []>} : vector<8x128xbf16>, vector<128x128xbf16>, vector<8x128xf32> -> vector<8x128xf32>
    %c0_14 = arith.constant 0 : index
    %c0_15 = arith.constant 0 : index
    %c0_16 = arith.constant 0 : index
    %19 = vector.load %arg7[%c0_14, %c0_15, %c0_16] : memref<3x1x128xf32, #tpu.memory_space<vmem>>, vector<1x1x128xf32>
    %20 = vector.shape_cast %19 : vector<1x1x128xf32> to vector<1x128xf32>
    %21 = vector.broadcast %20 : vector<1x128xf32> to vector<8x128xf32>
    %22 = arith.addf %18, %21 : vector<8x128xf32>
    %cst_17 = arith.constant 0.000000e+00 : f32
    %23 = vector.broadcast %cst_17 : f32 to vector<8x128xf32>
    %24 = arith.maximumf %22, %23 : vector<8x128xf32>
    %25 = arith.addf %14, %24 : vector<8x128xf32>
    %26 = arith.truncf %25 : vector<8x128xf32> to vector<8x128xbf16>
    %c1 = arith.constant 1 : index
    %c0_18 = arith.constant 0 : index
    %c0_19 = arith.constant 0 : index
    %27 = vector.load %arg6[%c1, %c0_18, %c0_19] : memref<3x128x128xbf16, #tpu.memory_space<vmem>>, vector<1x128x128xbf16>
    %28 = vector.shape_cast %27 : vector<1x128x128xbf16> to vector<128x128xbf16>
    %cst_20 = arith.constant dense<0.000000e+00> : vector<8x128xf32>
    %29 = tpu.matmul %26, %28, %cst_20 {dimension_numbers = #tpu.dot_dimension_numbers<[1], [0], [0], [1], [0, 0, 1, 1], [], []>} : vector<8x128xbf16>, vector<128x128xbf16>, vector<8x128xf32> -> vector<8x128xf32>
    %c1_21 = arith.constant 1 : index
    %c0_22 = arith.constant 0 : index
    %c0_23 = arith.constant 0 : index
    %30 = vector.load %arg7[%c1_21, %c0_22, %c0_23] : memref<3x1x128xf32, #tpu.memory_space<vmem>>, vector<1x1x128xf32>
    %31 = vector.shape_cast %30 : vector<1x1x128xf32> to vector<1x128xf32>
    %32 = vector.broadcast %31 : vector<1x128xf32> to vector<8x128xf32>
    %33 = arith.addf %29, %32 : vector<8x128xf32>
    %cst_24 = arith.constant 0.000000e+00 : f32
    %34 = vector.broadcast %cst_24 : f32 to vector<8x128xf32>
    %35 = arith.maximumf %33, %34 : vector<8x128xf32>
    %36 = arith.addf %25, %35 : vector<8x128xf32>
    %37 = arith.truncf %36 : vector<8x128xf32> to vector<8x128xbf16>
    %c2 = arith.constant 2 : index
    %c0_25 = arith.constant 0 : index
    %c0_26 = arith.constant 0 : index
    %38 = vector.load %arg6[%c2, %c0_25, %c0_26] : memref<3x128x128xbf16, #tpu.memory_space<vmem>>, vector<1x128x128xbf16>
    %39 = vector.shape_cast %38 : vector<1x128x128xbf16> to vector<128x128xbf16>
    %cst_27 = arith.constant dense<0.000000e+00> : vector<8x128xf32>
    %40 = tpu.matmul %37, %39, %cst_27 {dimension_numbers = #tpu.dot_dimension_numbers<[1], [0], [0], [1], [0, 0, 1, 1], [], []>} : vector<8x128xbf16>, vector<128x128xbf16>, vector<8x128xf32> -> vector<8x128xf32>
    %c2_28 = arith.constant 2 : index
    %c0_29 = arith.constant 0 : index
    %c0_30 = arith.constant 0 : index
    %41 = vector.load %arg7[%c2_28, %c0_29, %c0_30] : memref<3x1x128xf32, #tpu.memory_space<vmem>>, vector<1x1x128xf32>
    %42 = vector.shape_cast %41 : vector<1x1x128xf32> to vector<1x128xf32>
    %43 = vector.broadcast %42 : vector<1x128xf32> to vector<8x128xf32>
    %44 = arith.addf %40, %43 : vector<8x128xf32>
    %cst_31 = arith.constant 0.000000e+00 : f32
    %45 = vector.broadcast %cst_31 : f32 to vector<8x128xf32>
    %46 = arith.maximumf %44, %45 : vector<8x128xf32>
    %47 = arith.addf %36, %46 : vector<8x128xf32>
    %48 = arith.truncf %47 : vector<8x128xf32> to vector<8x128xbf16>
    %c0_32 = arith.constant 0 : index
    %c0_33 = arith.constant 0 : index
    %49 = vector.load %arg8[%c0_32, %c0_33] : memref<128x128xbf16, #tpu.memory_space<vmem>>, vector<128x128xbf16>
    %cst_34 = arith.constant dense<0.000000e+00> : vector<8x128xf32>
    %50 = tpu.matmul %48, %49, %cst_34 {dimension_numbers = #tpu.dot_dimension_numbers<[1], [0], [0], [1], [0, 0, 1, 1], [], []>} : vector<8x128xbf16>, vector<128x128xbf16>, vector<8x128xf32> -> vector<8x128xf32>
    %c0_35 = arith.constant 0 : index
    %c0_36 = arith.constant 0 : index
    %51 = vector.load %arg9[%c0_35, %c0_36] : memref<1x128xf32, #tpu.memory_space<vmem>>, vector<1x128xf32>
    %52 = vector.broadcast %51 : vector<1x128xf32> to vector<8x128xf32>
    %53 = arith.addf %50, %52 : vector<8x128xf32>
    %cst_37 = arith.constant 1.000000e+01 : f32
    %54 = vector.broadcast %cst_37 : f32 to vector<8x1xf32>
    %55 = arith.mulf %1, %54 : vector<8x1xf32>
    %56 = arith.mulf %55, %55 : vector<8x1xf32>
    %cst_38 = arith.constant 2.500000e-01 : f32
    %57 = vector.broadcast %cst_38 : f32 to vector<8x1xf32>
    %58 = arith.addf %57, %56 : vector<8x1xf32>
    %59 = math.rsqrt %58 : vector<8x1xf32>
    %cst_39 = arith.constant 2.500000e-01 : f32
    %60 = vector.broadcast %cst_39 : f32 to vector<8x1xf32>
    %61 = arith.mulf %60, %59 : vector<8x1xf32>
    %62 = arith.mulf %61, %59 : vector<8x1xf32>
    %63 = math.absf %55 : vector<8x1xf32>
    %cst_40 = arith.constant 5.000000e-01 : f32
    %64 = vector.broadcast %cst_40 : f32 to vector<8x1xf32>
    %65 = arith.mulf %64, %63 : vector<8x1xf32>
    %66 = arith.mulf %65, %59 : vector<8x1xf32>
    %67 = vector.broadcast %62 : vector<8x1xf32> to vector<8x128xf32>
    %68 = arith.mulf %0, %67 : vector<8x128xf32>
    %69 = vector.broadcast %66 : vector<8x1xf32> to vector<8x128xf32>
    %70 = arith.mulf %53, %69 : vector<8x128xf32>
    %71 = arith.addf %68, %70 : vector<8x128xf32>
    %c0_41 = arith.constant 0 : index
    %c0_42 = arith.constant 0 : index
    %72 = vector.load %arg10[%c0_41, %c0_42] : memref<8x128xf32, #tpu.memory_space<vmem>>, vector<8x128xf32>
    tpu.vector_store %arg10[%c0_41, %c0_42], %71 {strides = array<i32>} : memref<8x128xf32, #tpu.memory_space<vmem>>, vector<8x128xf32>,
    return
  }
  func.func @transform_0(%arg0: i32) -> (i32, i32) {
    %c0_i32 = arith.constant 0 : i32
    %c0_i32_0 = arith.constant 0 : i32
    return %arg0, %c0_i32 : i32, i32
  }
  func.func @transform_1(%arg0: i32) -> (i32, i32) {
    %c0_i32 = arith.constant 0 : i32
    %c0_i32_0 = arith.constant 0 : i32
    return %arg0, %c0_i32 : i32, i32
  }
  func.func @transform_2(%arg0: i32) -> (i32, i32) {
    %c0_i32 = arith.constant 0 : i32
    %c0_i32_0 = arith.constant 0 : i32
    %c0_i32_1 = arith.constant 0 : i32
    return %c0_i32, %c0_i32_0 : i32, i32
  }
  func.func @transform_3(%arg0: i32) -> (i32, i32) {
    %c0_i32 = arith.constant 0 : i32
    %c0_i32_0 = arith.constant 0 : i32
    %c0_i32_1 = arith.constant 0 : i32
    return %c0_i32, %c0_i32_0 : i32, i32
  }
  func.func @transform_4(%arg0: i32) -> (i32, i32) {
    %c0_i32 = arith.constant 0 : i32
    %c0_i32_0 = arith.constant 0 : i32
    %c0_i32_1 = arith.constant 0 : i32
    return %c0_i32, %c0_i32_0 : i32, i32
  }
  func.func @transform_5(%arg0: i32) -> (i32, i32, i32) {
    %c0_i32 = arith.constant 0 : i32
    %c0_i32_0 = arith.constant 0 : i32
    %c0_i32_1 = arith.constant 0 : i32
    %c0_i32_2 = arith.constant 0 : i32
    return %c0_i32, %c0_i32_0, %c0_i32_1 : i32, i32, i32
  }
  func.func @transform_6(%arg0: i32) -> (i32, i32, i32) {
    %c0_i32 = arith.constant 0 : i32
    %c0_i32_0 = arith.constant 0 : i32
    %c0_i32_1 = arith.constant 0 : i32
    %c0_i32_2 = arith.constant 0 : i32
    return %c0_i32, %c0_i32_0, %c0_i32_1 : i32, i32, i32
  }
  func.func @transform_7(%arg0: i32) -> (i32, i32) {
    %c0_i32 = arith.constant 0 : i32
    %c0_i32_0 = arith.constant 0 : i32
    %c0_i32_1 = arith.constant 0 : i32
    return %c0_i32, %c0_i32_0 : i32, i32
  }
  func.func @transform_8(%arg0: i32) -> (i32, i32) {
    %c0_i32 = arith.constant 0 : i32
    %c0_i32_0 = arith.constant 0 : i32
    %c0_i32_1 = arith.constant 0 : i32
    return %c0_i32, %c0_i32_0 : i32, i32
  }
  func.func @transform_9(%arg0: i32) -> (i32, i32) {
    %c0_i32 = arith.constant 0 : i32
    %c0_i32_0 = arith.constant 0 : i32
    return %arg0, %c0_i32 : i32, i32
  }
}

</mosaic_0001>

<bundles_post_ra>
// kernel: tpu_custom_call.1
= control target key start
LH: loop header
LB: loop body
LE: loop exit
PB: predicated region body
PF: predicated region fallthrough
CT: control target
= control target key end

     0   :  { %14 = vsyncpa [#allocation3], 0  ;;  %s1253_s0 = inlined_call_operand.vmem [shape: f32[8,128], index: 0, kind: input, shape index: {}]   ;;  %s1254_s1 = inlined_call_operand.vmem [shape: f32[8,1], index: 1, kind: input, shape index: {}]   ;;  %s1255_s2 = inlined_call_operand.hbm [shape: bf16[128,128], index: 2, kind: input, shape index: {}]   ;;  %s1256_s3 = inlined_call_operand.vmem [shape: f32[1,128], index: 3, kind: input, shape index: {}]   ;;  %s1257_s4 = inlined_call_operand.vmem [shape: f32[1,128], index: 4, kind: input, shape index: {}]   ;;  %s1258_s5 = inlined_call_operand.hbm [shape: bf16[3,128,128], index: 5, kind: input, shape index: {}]   ;;  %s1259_s6 = inlined_call_operand.vmem [shape: f32[3,1,128], index: 6, kind: input, shape index: {}]   ;;  %s1260_s7 = inlined_call_operand.hbm [shape: bf16[128,128], index: 7, kind: input, shape index: {}]   ;;  %s1261_s8 = inlined_call_operand.vmem [shape: f32[1,128], index: 8, kind: input, shape index: {}]   ;;  %s1262_s9 = inlined_call_operand.hbm [shape: f32[8,128], index: 9, kind: output, shape index: {}]  }
   0x1   :  { %15 = vsyncpa [#allocation6], 0 }
   0x2   :  { %16 = vsyncpa [#allocation4], 0  ;;  %s1041_s30 = smov [#allocation5]   ;;  %s1042_s11 = smov [#allocation2]  }
   0x3   :  { %s42_s10 = sshll.u32 %s1041_s30, 4  ;;  %s26_s12 = sshll.u32 %s1042_s11, 4  ;;  %s43_s10 = int_to_ptr.vmem [resolvable:$true] %s42_s10  ;;  %s1100_s12 = int_to_ptr.vmem [resolvable:$true] %s26_s12 }
   0x4   :  { %s947_s15 = scalar_lea.hbm %s1258_s5, 3072 }
   0x5   :  { %p948_p0 = scmp.ne.s32.totalorder %s1258_s5, %s947_s15  ;;  %p951_p1 = scmp.lt.u32.totalorder %s947_s15, %s1258_s5 }
   0x7   :  { %p953_p2 = pnand %p951_p1, %p948_p0 }
   0x9   :  { %956 = shalt.err (!%p953_p2)
}
   0xa   :  { %s957_s20 = scalar_lea.vmem %s43_s10, 3072  ;;  %p962_p4 = scmp.lt.s32.totalorder %s43_s10, %s43_s10 }
   0xb   :  { %p958_p3 = scmp.ne.s32.totalorder %s43_s10, %s957_s20  ;;  %p963_p5 = scmp.lt.s32.totalorder %s957_s20, %s957_s20 }
   0xd   :  { %p964_p6 = por %p963_p5, %p962_p4 }
   0xf   :  { %p965_p7 = pnand %p964_p6, %p958_p3 }
  0x11   :  { %968 = shalt.err (!%p965_p7)
}
  0x12   :  { %s1043_s21 = smov 64   ;;  %s1044_s22 = smov 4  }
  0x13   :  { %48 = dma.hbm_to_vmem [thread:$0]  %s1258_s5, 3072, %s43_s10, [#allocation6], %s1043_s21, %s1043_s21, %s1044_s22  }
  0x14   :  { %s969_s27 = scalar_lea.hbm %s1255_s2, 1024 }
  0x15   :  { %p970_p8 = scmp.ne.s32.totalorder %s1255_s2, %s969_s27  ;;  %p973_p9 = scmp.lt.u32.totalorder %s969_s27, %s1255_s2 }
  0x17   :  { %p975_p10 = pnand %p973_p9, %p970_p8 }
  0x19   :  { %978 = shalt.err (!%p975_p10)
}
  0x1a   :  { %s979_s13 = scalar_lea.vmem %s1100_s12, 1024  ;;  %p984_p12 = scmp.lt.s32.totalorder %s1100_s12, %s1100_s12 }
  0x1b   :  { %p980_p11 = scmp.ne.s32.totalorder %s1100_s12, %s979_s13  ;;  %p985_p13 = scmp.lt.s32.totalorder %s979_s13, %s979_s13 }
  0x1d   :  { %p986_p0 = por %p985_p13, %p984_p12 }
  0x1f   :  { %p987_p1 = pnand %p986_p0, %p980_p11 }
  0x21   :  { %990 = shalt.err (!%p987_p1)
}
  0x22   :  { %32 = dma.hbm_to_vmem [thread:$0]  %s1255_s2, 1024, %s1100_s12, [#allocation3], %s1043_s21, %s1043_s21, %s1044_s22  }
  0x23   :  { %s1045_s14 = smov [#allocation7]   ;;  %s991_s18 = scalar_lea.hbm %s1260_s7, 1024 }
  0x24   :  { %s56_s15 = sshll.u32 %s1045_s14, 4  ;;  %p992_p2 = scmp.ne.s32.totalorder %s1260_s7, %s991_s18  ;;  %s57_s15 = int_to_ptr.vmem [resolvable:$true] %s56_s15 }
  0x25   :  { %p995_p3 = scmp.lt.u32.totalorder %s991_s18, %s1260_s7 }
  0x27   :  { %p997_p4 = pnand %p995_p3, %p992_p2 }
  0x29   :  { %1000 = shalt.err (!%p997_p4)
}
  0x2a   :  { %s1001_s25 = scalar_lea.vmem %s57_s15, 1024  ;;  %p1006_p6 = scmp.lt.s32.totalorder %s57_s15, %s57_s15 }
  0x2b   :  { %p1002_p5 = scmp.ne.s32.totalorder %s57_s15, %s1001_s25  ;;  %p1007_p7 = scmp.lt.s32.totalorder %s1001_s25, %s1001_s25 }
  0x2d   :  { %p1008_p8 = por %p1007_p7, %p1006_p6 }
  0x2f   :  { %p1009_p9 = pnand %p1008_p8, %p1002_p5 }
  0x31   :  { %1012 = shalt.err (!%p1009_p9)
}
  0x32   :  { %62 = dma.hbm_to_vmem [thread:$0]  %s1260_s7, 1024, %s57_s15, [#allocation6], %s1043_s21, %s1043_s21, %s1044_s22  }
  0x33   :  { %1035 = dma.done.wait [#allocation3], 1024  }
  0x34   :  { %1036 = vsyncadd [#allocation3], 4294966272 }
  0x35   :  { %1037 = dma.done.wait [#allocation6], 4096  }
  0x36   :  { %1038 = vsyncadd [#allocation6], 4294963200  ;;  %v1046_v0 = vmov 0.0   ;;  %vm1047_vm0 = vmmov 0   ;;  %v1048_v1 = vmov 0   ;;  %v905_v2 = vld [vmem:[#allocation2] sm:$0xff]  }
  0x37   :  { %794 = vmatprep.subr.bf16.mxu0 %v1046_v0  ;;  %810 = vmatprep.mubr.msk.bf16.mxu0 %vm1047_vm0, %v1046_v0  ;;  %v906_v3 = vld [vmem:[#allocation2 + $0x8] sm:$0xff]   ;;  %v907_v4 = vld [vmem:[#allocation2 + $0x10] sm:$0xff]   ;;  %v76_v5 = vld [vmem:[%s1254_s1] sm:$0xff] }
  0x38   :  { %903 = vset.pattern.permute.xlu0 %v1048_v1  ;;  %814 = vmatprep.subr.bf16.mxu1 %v1046_v0  ;;  %v1163_v6 = vmul.f32 10.0, %v76_v5  ;;  %v913_v7 = vld [vmem:[#allocation5] sm:$0xff]   ;;  %v908_v8 = vld [vmem:[#allocation2 + $0x18] sm:$0xff]   ;;  %v914_v10 = vld [vmem:[#allocation5 + $0x8] sm:$0xff]  }
  0x39   :  { %830 = vmatprep.mubr.msk.bf16.mxu1 %vm1047_vm0, %v1046_v0  ;;  %904 = vset.pattern.permute.xlu1 %v1048_v1  ;;  %v909_v11 = vld [vmem:[#allocation2 + $0x20] sm:$0xff]   ;;  %v915_v13 = vld [vmem:[#allocation5 + $0x10] sm:$0xff]   ;;  %v910_v14 = vld [vmem:[#allocation2 + $0x28] sm:$0xff]  }
  0x3a   :  { %795 = vmatpush3.bf16.msra.mxu0 %v905_v2  ;;  %97 = vperm.xlu0 %903, %v76_v5   ;;  %v663_v9 = vmul.f32 %v1163_v6, %v1163_v6  ;;  %v916_v15 = vld [vmem:[#allocation5 + $0x18] sm:$0xff]   ;;  %v911_v16 = vld [vmem:[#allocation2 + $0x30] sm:$0xff]   ;;  %v917_v17 = vld [vmem:[#allocation5 + $0x20] sm:$0xff]  }
  0x3b   :  { %796 = vmatprep.subr.bf16.mxu0 %v1046_v0  ;;  %815 = vmatpush3.bf16.msra.mxu1 %v913_v7  ;;  %v912_v18 = vld [vmem:[#allocation2 + $0x38] sm:$0xff]   ;;  %v1177_v19 = vld [vmem:[%s1253_s0] sm:$0xff]  ;;  %v918_v22 = vld [vmem:[#allocation5 + $0x28] sm:$0xff]  }
  0x3c   :  { %816 = vmatprep.subr.bf16.mxu1 %v1046_v0  ;;  %v664_v12 = vadd.f32 0.25, %v663_v9  ;;  %v77_v24 = vpack.c.bf16 %v1177_v19, %v1177_v19  ;;  %v919_v25 = vld [vmem:[#allocation5 + $0x30] sm:$0xff]   ;;  %v920_v26 = vld [vmem:[#allocation5 + $0x38] sm:$0xff]   ;;  %v921_v27 = vld [vmem:[#allocation5 + $0x40] sm:$0xff]  }
  0x3d   :  { %v922_v28 = vld [vmem:[#allocation5 + $0x48] sm:$0xff]   ;;  %v923_v29 = vld [vmem:[#allocation5 + $0x50] sm:$0xff]   ;;  %v924_v30 = vld [vmem:[#allocation5 + $0x58] sm:$0xff]  }
  0x3e   :  { %797 = vmatpush3.bf16.msra.mxu0 %v906_v3  ;;  %945 = vrsqrt.f32 %v664_v12  ;;  %v925_v31 = vld [vmem:[#allocation5 + $0x60] sm:$0xff]   ;;  %v926_v32 = vld [vmem:[#allocation5 + $0x68] sm:$0xff]   ;;  %v927_v45 = vld [vmem:[#allocation5 + $0x70] sm:$0xff]  }
  0x3f   :  { %798 = vmatprep.subr.bf16.mxu0 %v1046_v0  ;;  %817 = vmatpush3.bf16.msra.mxu1 %v914_v10  ;;  %v701_v33 = vld [vmem:[%s1256_s3] ss:$0 sm:$0xff]  ;;  %v928_v46 = vld [vmem:[#allocation5 + $0x78] sm:$0xff]   ;;  %v930_v48 = vld [vmem:[#allocation5 + $0x88] sm:$0xff]  }
  0x40   :  { %818 = vmatprep.subr.bf16.mxu1 %v1046_v0  ;;  %v710_v37 = vld [vmem:[%s1257_s4] ss:$0 sm:$0xff]  ;;  %v931_v49 = vld [vmem:[#allocation5 + $0x90] sm:$0xff]   ;;  %v932_v50 = vld [vmem:[#allocation5 + $0x98] sm:$0xff]  }
  0x41   :  { %v929_v47 = vld [vmem:[#allocation5 + $0x80] sm:$0xff]   ;;  %v934_v52 = vld [vmem:[#allocation5 + $0xa8] sm:$0xff]   ;;  %v935_v62 = vld [vmem:[#allocation5 + $0xb0] sm:$0xff]  }
  0x42   :  { %799 = vmatpush3.bf16.msra.mxu0 %v907_v4  ;;  %v933_v51 = vld [vmem:[#allocation5 + $0xa0] sm:$0xff]   ;;  %v936_v63 = vld [vmem:[#allocation5 + $0xb8] sm:$0xff]   ;;  %v938_v2 = vld [vmem:[#allocation7 + $0x8] sm:$0xff]  }
  0x43   :  { %800 = vmatprep.subr.bf16.mxu0 %v1046_v0  ;;  %819 = vmatpush3.bf16.msra.mxu1 %v915_v13  ;;  %v711_v53 = vld [vmem:[%s1259_s6] ss:$0 sm:$0xff]  ;;  %v939_v3 = vld [vmem:[#allocation7 + $0x10] sm:$0xff]   ;;  %v940_v4 = vld [vmem:[#allocation7 + $0x18] sm:$0xff]  }
  0x44   :  { %820 = vmatprep.subr.bf16.mxu1 %v1046_v0  ;;  %v937_v1 = vld [vmem:[#allocation7] sm:$0xff]   ;;  %v942_v7 = vld [vmem:[#allocation7 + $0x28] sm:$0xff]  }
  0x45   :  { %v941_v5 = vld [vmem:[#allocation7 + $0x20] sm:$0xff]  }
  0x46   :  { %801 = vmatpush3.bf16.msra.mxu0 %v908_v8  ;;  %v721_v8 = vld [vmem:[%s1259_s6 + $0x1] ss:$0 sm:$0xff] }
  0x47   :  { %802 = vmatprep.subr.bf16.mxu0 %v1046_v0  ;;  %821 = vmatpush3.bf16.msra.mxu1 %v916_v15 }
  0x48   :  { %822 = vmatprep.subr.bf16.mxu1 %v1046_v0  ;;  %v1180_v20 = vpop.eup %945 }
  0x49   :  { %v666_v21 = vmul.f32 0.25, %v1180_v20 }
  0x4a   :  { %803 = vmatpush3.bf16.msra.mxu0 %v909_v11 }
  0x4b   :  { %804 = vmatprep.subr.bf16.mxu0 %v1046_v0  ;;  %823 = vmatpush3.bf16.msra.mxu1 %v917_v17  ;;  %v667_v23 = vmul.f32 %v1180_v20, %v666_v21  ;;  %v943_v17 = vld [vmem:[#allocation7 + $0x30] sm:$0xff]   ;;  %v668_v21 = vand.u32 2147483647, %v1163_v6  ;;  %v740_v6 = vld [vmem:[%s1261_s8] ss:$0 sm:$0xff] }
  0x4c   :  { %824 = vmatprep.subr.bf16.mxu1 %v1046_v0 }
  0x4d   :  { %673 = vperm.xlu0 %903, %v667_v23  }
  0x4e   :  { %805 = vmatpush3.bf16.msra.mxu0 %v910_v14 }
  0x4f   :  { %806 = vmatprep.subr.bf16.mxu0 %v1046_v0  ;;  %825 = vmatpush3.bf16.msra.mxu1 %v918_v22  ;;  %v669_v22 = vmul.f32 0.5, %v668_v21 }
  0x50   :  { %826 = vmatprep.subr.bf16.mxu1 %v1046_v0 }
  0x51   :  { %v670_v23 = vmul.f32 %v1180_v20, %v669_v22 }
  0x52   :  { %807 = vmatpush3.bf16.msra.mxu0 %v911_v16 }
  0x53   :  { %808 = vmatprep.subr.bf16.mxu0 %v1046_v0  ;;  %827 = vmatpush3.bf16.msra.mxu1 %v919_v25 }
  0x54   :  { %828 = vmatprep.subr.bf16.mxu1 %v1046_v0  ;;  %679 = vperm.xlu1 %904, %v670_v23  }
  0x56   :  { %809 = vmatpush3.bf16.msra.mxu0 %v912_v18  ;;  %v944_v18 = vld [vmem:[#allocation7 + $0x38] sm:$0xff]  }
  0x57   :  { %834 = vmatprep.subr.bf16.mxu0 %v1046_v0  ;;  %829 = vmatpush3.bf16.msra.mxu1 %v920_v26 }
  0x58   :  { %854 = vmatprep.subr.bf16.mxu1 %v1046_v0 }
  0x59   :  { %811 = vmatmul.mubr.bf16.vlgmr.msra.gmra.mrb[0].mxu0 %v77_v24  ;;  %v731_v24 = vld [vmem:[%s1259_s6 + $0x2] ss:$0 sm:$0xff]  ;;  %s1049_s6 = smov [#allocation8]  }
  0x5a   :  { %850 = vmatprep.mubr.msk.bf16.mxu0 %vm1047_vm0, %v1046_v0  ;;  %835 = vmatpush3.bf16.msra.mxu0 %v921_v27  ;;  %s691_s14 = sshll.u32 %s1049_s6, 4  ;;  %s692_s14 = int_to_ptr.vmem [resolvable:$true] %s691_s14 }
  0x5b   :  { %836 = vmatprep.subr.bf16.mxu0 %v1046_v0  ;;  %s1013_s15 = scalar_lea.vmem %s692_s14, 128  ;;  %p1018_p11 = scmp.lt.s32.totalorder %s692_s14, %s692_s14 }
  0x5c   :  { %p1014_p10 = scmp.ne.s32.totalorder %s692_s14, %s1013_s15  ;;  %p1019_p12 = scmp.lt.s32.totalorder %s1013_s15, %s1013_s15 }
  0x5e   :  { %837 = vmatpush3.bf16.msra.mxu0 %v922_v28  ;;  %p1020_p13 = por %p1019_p12, %p1018_p11 }
  0x5f   :  { %838 = vmatprep.subr.bf16.mxu0 %v1046_v0 }
  0x60   :  { %p1021_p0 = pnand %p1020_p13, %p1014_p10 }
  0x62   :  { %839 = vmatpush3.bf16.msra.mxu0 %v923_v29 }
  0x63   :  { %840 = vmatprep.subr.bf16.mxu0 %v1046_v0 }
  0x66   :  { %841 = vmatpush3.bf16.msra.mxu0 %v924_v30 }
  0x67   :  { %842 = vmatprep.subr.bf16.mxu0 %v1046_v0 }
  0x6a   :  { %843 = vmatpush3.bf16.msra.mxu0 %v925_v31 }
  0x6b   :  { %844 = vmatprep.subr.bf16.mxu0 %v1046_v0 }
  0x6e   :  { %845 = vmatpush3.bf16.msra.mxu0 %v926_v32 }
  0x6f   :  { %846 = vmatprep.subr.bf16.mxu0 %v1046_v0 }
  0x72   :  { %847 = vmatpush3.bf16.msra.mxu0 %v927_v45 }
  0x73   :  { %848 = vmatprep.subr.bf16.mxu0 %v1046_v0 }
  0x76   :  { %849 = vmatpush3.bf16.msra.mxu0 %v928_v46 }
  0x77   :  { %874 = vmatprep.subr.bf16.mxu0 %v1046_v0 }
  0xb9   :  { %v98_v34 = vpop.permute.xlu0 %97 }
  0xba   :  { %v106_v35 = vmul.f32 %v701_v33, %v98_v34 }
  0xcc   :  { %v674_v32 = vpop.permute.xlu0 %673 }
  0xd3   :  { %v680_v33 = vpop.permute.xlu1 %679 }
 0x12c   :  { %v189_v36 = vpop.f32.mrb[0].mxu0 }
 0x12d   :  { %v190_v38 = vadd.f32 %v189_v36, %v106_v35  ;;  %v812_v39 = vpop.f32.mrb[1].mxu0 }
 0x12e   :  { %v192_v40 = vpop.f32.mrb[2].mxu0 }
 0x12f   :  { %v202_v41 = vadd.f32 %v710_v37, %v190_v38  ;;  %v813_v42 = vpop.f32.mrb[3].mxu0  ;;  %v676_v37 = vmul.f32 %v674_v32, %v1177_v19 }
 0x131   :  { %v203_v43 = vmax.f32 %v202_v41, 0.0 }
 0x133   :  { %v204_v44 = vpack.c.bf16 %v203_v43, %v203_v43 }
 0x135   :  { %831 = vmatmul.mubr.bf16.vlgmr.msra.gmra.mrb[0].mxu1 %v204_v44 }
 0x136   :  { %870 = vmatprep.mubr.msk.bf16.mxu1 %vm1047_vm0, %v1046_v0  ;;  %855 = vmatpush3.bf16.msra.mxu1 %v929_v47 }
 0x137   :  { %856 = vmatprep.subr.bf16.mxu1 %v1046_v0 }
 0x13a   :  { %857 = vmatpush3.bf16.msra.mxu1 %v930_v48 }
 0x13b   :  { %858 = vmatprep.subr.bf16.mxu1 %v1046_v0 }
 0x13e   :  { %859 = vmatpush3.bf16.msra.mxu1 %v931_v49 }
 0x13f   :  { %860 = vmatprep.subr.bf16.mxu1 %v1046_v0 }
 0x142   :  { %861 = vmatpush3.bf16.msra.mxu1 %v932_v50 }
 0x143   :  { %862 = vmatprep.subr.bf16.mxu1 %v1046_v0 }
 0x146   :  { %863 = vmatpush3.bf16.msra.mxu1 %v933_v51 }
 0x147   :  { %864 = vmatprep.subr.bf16.mxu1 %v1046_v0 }
 0x14a   :  { %865 = vmatpush3.bf16.msra.mxu1 %v934_v52 }
 0x14b   :  { %866 = vmatprep.subr.bf16.mxu1 %v1046_v0 }
 0x14e   :  { %867 = vmatpush3.bf16.msra.mxu1 %v935_v62 }
 0x14f   :  { %868 = vmatprep.subr.bf16.mxu1 %v1046_v0 }
 0x152   :  { %869 = vmatpush3.bf16.msra.mxu1 %v936_v63 }
 0x208   :  { %v310_v54 = vpop.f32.mrb[0].mxu1 }
 0x209   :  { %v311_v55 = vadd.f32 %v711_v53, %v310_v54  ;;  %v832_v56 = vpop.f32.mrb[1].mxu1 }
 0x20a   :  { %v313_v57 = vpop.f32.mrb[2].mxu1 }
 0x20b   :  { %v316_v58 = vmax.f32 %v311_v55, 0.0  ;;  %v833_v59 = vpop.f32.mrb[3].mxu1 }
 0x20d   :  { %v317_v60 = vadd.f32 %v316_v58, %v203_v43 }
 0x20f   :  { %v318_v61 = vpack.c.bf16 %v317_v60, %v317_v60 }
 0x211   :  { %851 = vmatmul.mubr.bf16.vlgmr.msra.gmra.mrb[4].mxu0 %v318_v61 }
 0x212   :  { %890 = vmatprep.mubr.msk.bf16.mxu0 %vm1047_vm0, %v1046_v0  ;;  %875 = vmatpush3.bf16.msra.mxu0 %v937_v1 }
 0x213   :  { %876 = vmatprep.subr.bf16.mxu0 %v1046_v0 }
 0x216   :  { %877 = vmatpush3.bf16.msra.mxu0 %v938_v2 }
 0x217   :  { %878 = vmatprep.subr.bf16.mxu0 %v1046_v0 }
 0x21a   :  { %879 = vmatpush3.bf16.msra.mxu0 %v939_v3 }
 0x21b   :  { %880 = vmatprep.subr.bf16.mxu0 %v1046_v0 }
 0x21e   :  { %881 = vmatpush3.bf16.msra.mxu0 %v940_v4 }
 0x21f   :  { %882 = vmatprep.subr.bf16.mxu0 %v1046_v0 }
 0x222   :  { %883 = vmatpush3.bf16.msra.mxu0 %v941_v5 }
 0x223   :  { %884 = vmatprep.subr.bf16.mxu0 %v1046_v0 }
 0x226   :  { %885 = vmatpush3.bf16.msra.mxu0 %v942_v7 }
 0x227   :  { %886 = vmatprep.subr.bf16.mxu0 %v1046_v0 }
 0x22a   :  { %887 = vmatpush3.bf16.msra.mxu0 %v943_v17 }
 0x22b   :  { %888 = vmatprep.subr.bf16.mxu0 %v1046_v0 }
 0x22e   :  { %889 = vmatpush3.bf16.msra.mxu0 %v944_v18 }
 0x2e4   :  { %v426_v9 = vpop.f32.mrb[4].mxu0 }
 0x2e5   :  { %v427_v10 = vadd.f32 %v721_v8, %v426_v9  ;;  %v852_v11 = vpop.f32.mrb[5].mxu0 }
 0x2e6   :  { %v429_v12 = vpop.f32.mrb[6].mxu0 }
 0x2e7   :  { %v432_v13 = vmax.f32 %v427_v10, 0.0  ;;  %v853_v14 = vpop.f32.mrb[7].mxu0 }
 0x2e9   :  { %v433_v15 = vadd.f32 %v432_v13, %v317_v60 }
 0x2eb   :  { %v434_v16 = vpack.c.bf16 %v433_v15, %v433_v15 }
 0x2ed   :  { %871 = vmatmul.mubr.bf16.vlgmr.msra.gmra.mrb[4].mxu1 %v434_v16 }
 0x3c0   :  { %v542_v25 = vpop.f32.mrb[4].mxu1 }
 0x3c1   :  { %v543_v26 = vadd.f32 %v731_v24, %v542_v25  ;;  %v872_v27 = vpop.f32.mrb[5].mxu1 }
 0x3c2   :  { %v545_v28 = vpop.f32.mrb[6].mxu1 }
 0x3c3   :  { %v548_v29 = vmax.f32 %v543_v26, 0.0  ;;  %v873_v30 = vpop.f32.mrb[7].mxu1 }
 0x3c5   :  { %v549_v31 = vadd.f32 %v548_v29, %v433_v15 }
 0x3c7   :  { %v550_v0 = vpack.c.bf16 %v549_v31, %v549_v31 }
 0x3c9   :  { %891 = vmatmul.mubr.bf16.vlgmr.msra.gmra.mrb[8].mxu0 %v550_v0 }
 0x49c   :  { %v656_v20 = vpop.f32.mrb[8].mxu0 }
 0x49d   :  { %v657_v34 = vadd.f32 %v740_v6, %v656_v20  ;;  %v892_v35 = vpop.f32.mrb[9].mxu0 }
 0x49e   :  { %v659_v36 = vpop.f32.mrb[10].mxu0 }
 0x49f   :  { %v682_v38 = vmul.f32 %v680_v33, %v657_v34  ;;  %v893_v39 = vpop.f32.mrb[11].mxu0 }
 0x4a1   :  { %v683_v40 = vadd.f32 %v682_v38, %v676_v37 }
 0x4a3   :  { %684 = vst [vmem:[#allocation8] sm:$0xff] %v683_v40 }
 0x4a4   :  { %1024 = shalt.err (!%p1021_p0)
}
 0x4a5   :  { %s1025_s17 = scalar_lea.hbm %s1262_s9, 128 }
 0x4a6   :  { %p1026_p1 = scmp.ne.s32.totalorder %s1262_s9, %s1025_s17  ;;  %p1029_p2 = scmp.lt.u32.totalorder %s1025_s17, %s1262_s9 }
 0x4a8   :  { %p1031_p3 = pnand %p1029_p2, %p1026_p1 }
 0x4aa   :  { %1034 = shalt.err (!%p1031_p3)
}
 0x4ab   :  { %694 = dma.vmem_to_hbm [thread:$0]  %s692_s14, 128, %s1262_s9, [#allocation4]  }
 0x4ac   :  { %1039 = dma.done.wait [#allocation4], 128  }
 0x4ad   :  { %1040 = vsyncadd [#allocation4], 4294967168 }
 0x4ae   :  { %698 = vsyncpa [#allocation3], 1 }
 0x4af   :  { %699 = vsyncpa [#allocation6], 1 }
 0x4b0   :  { %700 = vsyncpa [#allocation4], 1 }

// kernel: tpu_custom_call.1
= control target key start
LH: loop header
LB: loop body
LE: loop exit
PB: predicated region body
PF: predicated region fallthrough
CT: control target
= control target key end

     0   :  { %14 = vsyncpa [#allocation3], 0  ;;  %s1253_s0 = inlined_call_operand.vmem [shape: f32[8,128], index: 0, kind: input, shape index: {}]   ;;  %s1254_s1 = inlined_call_operand.vmem [shape: f32[8,1], index: 1, kind: input, shape index: {}]   ;;  %s1255_s2 = inlined_call_operand.hbm [shape: bf16[128,128], index: 2, kind: input, shape index: {}]   ;;  %s1256_s3 = inlined_call_operand.vmem [shape: f32[1,128], index: 3, kind: input, shape index: {}]   ;;  %s1257_s4 = inlined_call_operand.vmem [shape: f32[1,128], index: 4, kind: input, shape index: {}]   ;;  %s1258_s5 = inlined_call_operand.hbm [shape: bf16[3,128,128], index: 5, kind: input, shape index: {}]   ;;  %s1259_s6 = inlined_call_operand.vmem [shape: f32[3,1,128], index: 6, kind: input, shape index: {}]   ;;  %s1260_s7 = inlined_call_operand.hbm [shape: bf16[128,128], index: 7, kind: input, shape index: {}]   ;;  %s1261_s8 = inlined_call_operand.vmem [shape: f32[1,128], index: 8, kind: input, shape index: {}]   ;;  %s1262_s9 = inlined_call_operand.hbm [shape: f32[8,128], index: 9, kind: output, shape index: {}]  }
   0x1   :  { %15 = vsyncpa [#allocation6], 0 }
   0x2   :  { %16 = vsyncpa [#allocation4], 0  ;;  %s1041_s30 = smov [#allocation5]   ;;  %s1042_s11 = smov [#allocation2]  }
   0x3   :  { %s42_s10 = sshll.u32 %s1041_s30, 4  ;;  %s26_s12 = sshll.u32 %s1042_s11, 4  ;;  %s43_s10 = int_to_ptr.vmem [resolvable:$true] %s42_s10  ;;  %s1100_s12 = int_to_ptr.vmem [resolvable:$true] %s26_s12 }
   0x4   :  { %s947_s15 = scalar_lea.hbm %s1258_s5, 3072 }
   0x5   :  { %p948_p0 = scmp.ne.s32.totalorder %s1258_s5, %s947_s15  ;;  %p951_p1 = scmp.lt.u32.totalorder %s947_s15, %s1258_s5 }
   0x7   :  { %p953_p2 = pnand %p951_p1, %p948_p0 }
   0x9   :  { %956 = shalt.err (!%p953_p2)
}
   0xa   :  { %s957_s20 = scalar_lea.vmem %s43_s10, 3072  ;;  %p962_p4 = scmp.lt.s32.totalorder %s43_s10, %s43_s10 }
   0xb   :  { %p958_p3 = scmp.ne.s32.totalorder %s43_s10, %s957_s20  ;;  %p963_p5 = scmp.lt.s32.totalorder %s957_s20, %s957_s20 }
   0xd   :  { %p964_p6 = por %p963_p5, %p962_p4 }
   0xf   :  { %p965_p7 = pnand %p964_p6, %p958_p3 }
  0x11   :  { %968 = shalt.err (!%p965_p7)
}
  0x12   :  { %s1043_s21 = smov 64   ;;  %s1044_s22 = smov 4  }
  0x13   :  { %48 = dma.hbm_to_vmem [thread:$0]  %s1258_s5, 3072, %s43_s10, [#allocation6], %s1043_s21, %s1043_s21, %s1044_s22  }
  0x14   :  { %s969_s27 = scalar_lea.hbm %s1255_s2, 1024 }
  0x15   :  { %p970_p8 = scmp.ne.s32.totalorder %s1255_s2, %s969_s27  ;;  %p973_p9 = scmp.lt.u32.totalorder %s969_s27, %s1255_s2 }
  0x17   :  { %p975_p10 = pnand %p973_p9, %p970_p8 }
  0x19   :  { %978 = shalt.err (!%p975_p10)
}
  0x1a   :  { %s979_s13 = scalar_lea.vmem %s1100_s12, 1024  ;;  %p984_p12 = scmp.lt.s32.totalorder %s1100_s12, %s1100_s12 }
  0x1b   :  { %p980_p11 = scmp.ne.s32.totalorder %s1100_s12, %s979_s13  ;;  %p985_p13 = scmp.lt.s32.totalorder %s979_s13, %s979_s13 }
  0x1d   :  { %p986_p0 = por %p985_p13, %p984_p12 }
  0x1f   :  { %p987_p1 = pnand %p986_p0, %p980_p11 }
  0x21   :  { %990 = shalt.err (!%p987_p1)
}
  0x22   :  { %32 = dma.hbm_to_vmem [thread:$0]  %s1255_s2, 1024, %s1100_s12, [#allocation3], %s1043_s21, %s1043_s21, %s1044_s22  }
  0x23   :  { %s1045_s14 = smov [#allocation7]   ;;  %s991_s18 = scalar_lea.hbm %s1260_s7, 1024 }
  0x24   :  { %s56_s15 = sshll.u32 %s1045_s14, 4  ;;  %p992_p2 = scmp.ne.s32.totalorder %s1260_s7, %s991_s18  ;;  %s57_s15 = int_to_ptr.vmem [resolvable:$true] %s56_s15 }
  0x25   :  { %p995_p3 = scmp.lt.u32.totalorder %s991_s18, %s1260_s7 }
  0x27   :  { %p997_p4 = pnand %p995_p3, %p992_p2 }
  0x29   :  { %1000 = shalt.err (!%p997_p4)
}
  0x2a   :  { %s1001_s25 = scalar_lea.vmem %s57_s15, 1024  ;;  %p1006_p6 = scmp.lt.s32.totalorder %s57_s15, %s57_s15 }
  0x2b   :  { %p1002_p5 = scmp.ne.s32.totalorder %s57_s15, %s1001_s25  ;;  %p1007_p7 = scmp.lt.s32.totalorder %s1001_s25, %s1001_s25 }
  0x2d   :  { %p1008_p8 = por %p1007_p7, %p1006_p6 }
  0x2f   :  { %p1009_p9 = pnand %p1008_p8, %p1002_p5 }
  0x31   :  { %1012 = shalt.err (!%p1009_p9)
}
  0x32   :  { %62 = dma.hbm_to_vmem [thread:$0]  %s1260_s7, 1024, %s57_s15, [#allocation6], %s1043_s21, %s1043_s21, %s1044_s22  }
  0x33   :  { %1035 = dma.done.wait [#allocation3], 1024  }
  0x34   :  { %1036 = vsyncadd [#allocation3], 4294966272 }
  0x35   :  { %1037 = dma.done.wait [#allocation6], 4096  }
  0x36   :  { %1038 = vsyncadd [#allocation6], 4294963200  ;;  %v1046_v0 = vmov 0.0   ;;  %vm1047_vm0 = vmmov 0   ;;  %v1048_v1 = vmov 0   ;;  %v905_v2 = vld [vmem:[#allocation2] sm:$0xff]  }
  0x37   :  { %794 = vmatprep.subr.bf16.mxu0 %v1046_v0  ;;  %810 = vmatprep.mubr.msk.bf16.mxu0 %vm1047_vm0, %v1046_v0  ;;  %v906_v3 = vld [vmem:[#allocation2 + $0x8] sm:$0xff]   ;;  %v907_v4 = vld [vmem:[#allocation2 + $0x10] sm:$0xff]   ;;  %v76_v5 = vld [vmem:[%s1254_s1] sm:$0xff] }
  0x38   :  { %903 = vset.pattern.permute.xlu0 %v1048_v1  ;;  %814 = vmatprep.subr.bf16.mxu1 %v1046_v0  ;;  %v1163_v6 = vmul.f32 10.0, %v76_v5  ;;  %v913_v7 = vld [vmem:[#allocation5] sm:$0xff]   ;;  %v908_v8 = vld [vmem:[#allocation2 + $0x18] sm:$0xff]   ;;  %v914_v10 = vld [vmem:[#allocation5 + $0x8] sm:$0xff]  }
  0x39   :  { %830 = vmatprep.mubr.msk.bf16.mxu1 %vm1047_vm0, %v1046_v0  ;;  %904 = vset.pattern.permute.xlu1 %v1048_v1  ;;  %v909_v11 = vld [vmem:[#allocation2 + $0x20] sm:$0xff]   ;;  %v915_v13 = vld [vmem:[#allocation5 + $0x10] sm:$0xff]   ;;  %v910_v14 = vld [vmem:[#allocation2 + $0x28] sm:$0xff]  }
  0x3a   :  { %795 = vmatpush3.bf16.msra.mxu0 %v905_v2  ;;  %97 = vperm.xlu0 %903, %v76_v5   ;;  %v663_v9 = vmul.f32 %v1163_v6, %v1163_v6  ;;  %v916_v15 = vld [vmem:[#allocation5 + $0x18] sm:$0xff]   ;;  %v911_v16 = vld [vmem:[#allocation2 + $0x30] sm:$0xff]   ;;  %v917_v17 = vld [vmem:[#allocation5 + $0x20] sm:$0xff]  }
  0x3b   :  { %796 = vmatprep.subr.bf16.mxu0 %v1046_v0  ;;  %815 = vmatpush3.bf16.msra.mxu1 %v913_v7  ;;  %v912_v18 = vld [vmem:[#allocation2 + $0x38] sm:$0xff]   ;;  %v1177_v19 = vld [vmem:[%s1253_s0] sm:$0xff]  ;;  %v918_v22 = vld [vmem:[#allocation5 + $0x28] sm:$0xff]  }
  0x3c   :  { %816 = vmatprep.subr.bf16.mxu1 %v1046_v0  ;;  %v664_v12 = vadd.f32 0.25, %v663_v9  ;;  %v77_v24 = vpack.c.bf16 %v1177_v19, %v1177_v19  ;;  %v919_v25 = vld [vmem:[#allocation5 + $0x30] sm:$0xff]   ;;  %v920_v26 = vld [vmem:[#allocation5 + $0x38] sm:$0xff]   ;;  %v921_v27 = vld [vmem:[#allocation5 + $0x40] sm:$0xff]  }
  0x3d   :  { %v922_v28 = vld [vmem:[#allocation5 + $0x48] sm:$0xff]   ;;  %v923_v29 = vld [vmem:[#allocation5 + $0x50] sm:$0xff]   ;;  %v924_v30 = vld [vmem:[#allocation5 + $0x58] sm:$0xff]  }
  0x3e   :  { %797 = vmatpush3.bf16.msra.mxu0 %v906_v3  ;;  %945 = vrsqrt.f32 %v664_v12  ;;  %v925_v31 = vld [vmem:[#allocation5 + $0x60] sm:$0xff]   ;;  %v926_v32 = vld [vmem:[#allocation5 + $0x68] sm:$0xff]   ;;  %v927_v45 = vld [vmem:[#allocation5 + $0x70] sm:$0xff]  }
  0x3f   :  { %798 = vmatprep.subr.bf16.mxu0 %v1046_v0  ;;  %817 = vmatpush3.bf16.msra.mxu1 %v914_v10  ;;  %v701_v33 = vld [vmem:[%s1256_s3] ss:$0 sm:$0xff]  ;;  %v928_v46 = vld [vmem:[#allocation5 + $0x78] sm:$0xff]   ;;  %v930_v48 = vld [vmem:[#allocation5 + $0x88] sm:$0xff]  }
  0x40   :  { %818 = vmatprep.subr.bf16.mxu1 %v1046_v0  ;;  %v710_v37 = vld [vmem:[%s1257_s4] ss:$0 sm:$0xff]  ;;  %v931_v49 = vld [vmem:[#allocation5 + $0x90] sm:$0xff]   ;;  %v932_v50 = vld [vmem:[#allocation5 + $0x98] sm:$0xff]  }
  0x41   :  { %v929_v47 = vld [vmem:[#allocation5 + $0x80] sm:$0xff]   ;;  %v934_v52 = vld [vmem:[#allocation5 + $0xa8] sm:$0xff]   ;;  %v935_v62 = vld [vmem:[#allocation5 + $0xb0] sm:$0xff]  }
  0x42   :  { %799 = vmatpush3.bf16.msra.mxu0 %v907_v4  ;;  %v933_v51 = vld [vmem:[#allocation5 + $0xa0] sm:$0xff]   ;;  %v936_v63 = vld [vmem:[#allocation5 + $0xb8] sm:$0xff]   ;;  %v938_v2 = vld [vmem:[#allocation7 + $0x8] sm:$0xff]  }
  0x43   :  { %800 = vmatprep.subr.bf16.mxu0 %v1046_v0  ;;  %819 = vmatpush3.bf16.msra.mxu1 %v915_v13  ;;  %v711_v53 = vld [vmem:[%s1259_s6] ss:$0 sm:$0xff]  ;;  %v939_v3 = vld [vmem:[#allocation7 + $0x10] sm:$0xff]   ;;  %v940_v4 = vld [vmem:[#allocation7 + $0x18] sm:$0xff]  }
  0x44   :  { %820 = vmatprep.subr.bf16.mxu1 %v1046_v0  ;;  %v937_v1 = vld [vmem:[#allocation7] sm:$0xff]   ;;  %v942_v7 = vld [vmem:[#allocation7 + $0x28] sm:$0xff]  }
  0x45   :  { %v941_v5 = vld [vmem:[#allocation7 + $0x20] sm:$0xff]  }
  0x46   :  { %801 = vmatpush3.bf16.msra.mxu0 %v908_v8  ;;  %v721_v8 = vld [vmem:[%s1259_s6 + $0x1] ss:$0 sm:$0xff] }
  0x47   :  { %802 = vmatprep.subr.bf16.mxu0 %v1046_v0  ;;  %821 = vmatpush3.bf16.msra.mxu1 %v916_v15 }
  0x48   :  { %822 = vmatprep.subr.bf16.mxu1 %v1046_v0  ;;  %v1180_v20 = vpop.eup %945 }
  0x49   :  { %v666_v21 = vmul.f32 0.25, %v1180_v20 }
  0x4a   :  { %803 = vmatpush3.bf16.msra.mxu0 %v909_v11 }
  0x4b   :  { %804 = vmatprep.subr.bf16.mxu0 %v1046_v0  ;;  %823 = vmatpush3.bf16.msra.mxu1 %v917_v17  ;;  %v667_v23 = vmul.f32 %v1180_v20, %v666_v21  ;;  %v943_v17 = vld [vmem:[#allocation7 + $0x30] sm:$0xff]   ;;  %v668_v21 = vand.u32 2147483647, %v1163_v6  ;;  %v740_v6 = vld [vmem:[%s1261_s8] ss:$0 sm:$0xff] }
  0x4c   :  { %824 = vmatprep.subr.bf16.mxu1 %v1046_v0 }
  0x4d   :  { %673 = vperm.xlu0 %903, %v667_v23  }
  0x4e   :  { %805 = vmatpush3.bf16.msra.mxu0 %v910_v14 }
  0x4f   :  { %806 = vmatprep.subr.bf16.mxu0 %v1046_v0  ;;  %825 = vmatpush3.bf16.msra.mxu1 %v918_v22  ;;  %v669_v22 = vmul.f32 0.5, %v668_v21 }
  0x50   :  { %826 = vmatprep.subr.bf16.mxu1 %v1046_v0 }
  0x51   :  { %v670_v23 = vmul.f32 %v1180_v20, %v669_v22 }
  0x52   :  { %807 = vmatpush3.bf16.msra.mxu0 %v911_v16 }
  0x53   :  { %808 = vmatprep.subr.bf16.mxu0 %v1046_v0  ;;  %827 = vmatpush3.bf16.msra.mxu1 %v919_v25 }
  0x54   :  { %828 = vmatprep.subr.bf16.mxu1 %v1046_v0  ;;  %679 = vperm.xlu1 %904, %v670_v23  }
  0x56   :  { %809 = vmatpush3.bf16.msra.mxu0 %v912_v18  ;;  %v944_v18 = vld [vmem:[#allocation7 + $0x38] sm:$0xff]  }
  0x57   :  { %834 = vmatprep.subr.bf16.mxu0 %v1046_v0  ;;  %829 = vmatpush3.bf16.msra.mxu1 %v920_v26 }
  0x58   :  { %854 = vmatprep.subr.bf16.mxu1 %v1046_v0 }
  0x59   :  { %811 = vmatmul.mubr.bf16.vlgmr.msra.gmra.mrb[0].mxu0 %v77_v24  ;;  %v731_v24 = vld [vmem:[%s1259_s6 + $0x2] ss:$0 sm:$0xff]  ;;  %s1049_s6 = smov [#allocation8]  }
  0x5a   :  { %850 = vmatprep.mubr.msk.bf16.mxu0 %vm1047_vm0, %v1046_v0  ;;  %835 = vmatpush3.bf16.msra.mxu0 %v921_v27  ;;  %s691_s14 = sshll.u32 %s1049_s6, 4  ;;  %s692_s14 = int_to_ptr.vmem [resolvable:$true] %s691_s14 }
  0x5b   :  { %836 = vmatprep.subr.bf16.mxu0 %v1046_v0  ;;  %s1013_s15 = scalar_lea.vmem %s692_s14, 128  ;;  %p1018_p11 = scmp.lt.s32.totalorder %s692_s14, %s692_s14 }
  0x5c   :  { %p1014_p10 = scmp.ne.s32.totalorder %s692_s14, %s1013_s15  ;;  %p1019_p12 = scmp.lt.s32.totalorder %s1013_s15, %s1013_s15 }
  0x5e   :  { %837 = vmatpush3.bf16.msra.mxu0 %v922_v28  ;;  %p1020_p13 = por %p1019_p12, %p1018_p11 }
  0x5f   :  { %838 = vmatprep.subr.bf16.mxu0 %v1046_v0 }
  0x60   :  { %p1021_p0 = pnand %p1020_p13, %p1014_p10 }
  0x62   :  { %839 = vmatpush3.bf16.msra.mxu0 %v923_v29 }
  0x63   :  { %840 = vmatprep.subr.bf16.mxu0 %v1046_v0 }
  0x66   :  { %841 = vmatpush3.bf16.msra.mxu0 %v924_v30 }
  0x67   :  { %842 = vmatprep.subr.bf16.mxu0 %v1046_v0 }
  0x6a   :  { %843 = vmatpush3.bf16.msra.mxu0 %v925_v31 }
  0x6b   :  { %844 = vmatprep.subr.bf16.mxu0 %v1046_v0 }
  0x6e   :  { %845 = vmatpush3.bf16.msra.mxu0 %v926_v32 }
  0x6f   :  { %846 = vmatprep.subr.bf16.mxu0 %v1046_v0 }
  0x72   :  { %847 = vmatpush3.bf16.msra.mxu0 %v927_v45 }
  0x73   :  { %848 = vmatprep.subr.bf16.mxu0 %v1046_v0 }
  0x76   :  { %849 = vmatpush3.bf16.msra.mxu0 %v928_v46 }
  0x77   :  { %874 = vmatprep.subr.bf16.mxu0 %v1046_v0 }
  0xb9   :  { %v98_v34 = vpop.permute.xlu0 %97 }
  0xba   :  { %v106_v35 = vmul.f32 %v701_v33, %v98_v34 }
  0xcc   :  { %v674_v32 = vpop.permute.xlu0 %673 }
  0xd3   :  { %v680_v33 = vpop.permute.xlu1 %679 }
 0x12c   :  { %v189_v36 = vpop.f32.mrb[0].mxu0 }
 0x12d   :  { %v190_v38 = vadd.f32 %v189_v36, %v106_v35  ;;  %v812_v39 = vpop.f32.mrb[1].mxu0 }
 0x12e   :  { %v192_v40 = vpop.f32.mrb[2].mxu0 }
 0x12f   :  { %v202_v41 = vadd.f32 %v710_v37, %v190_v38  ;;  %v813_v42 = vpop.f32.mrb[3].mxu0  ;;  %v676_v37 = vmul.f32 %v674_v32, %v1177_v19 }
 0x131   :  { %v203_v43 = vmax.f32 %v202_v41, 0.0 }
 0x133   :  { %v204_v44 = vpack.c.bf16 %v203_v43, %v203_v43 }
 0x135   :  { %831 = vmatmul.mubr.bf16.vlgmr.msra.gmra.mrb[0].mxu1 %v204_v44 }
 0x136   :  { %870 = vmatprep.mubr.msk.bf16.mxu1 %vm1047_vm0, %v1046_v0  ;;  %855 = vmatpush3.bf16.msra.mxu1 %v929_v47 }
 0x137   :  { %856 = vmatprep.subr.bf16.mxu1 %v1046_v0 }
 0x13a   :  { %857 = vmatpush3.bf16.msra.mxu1 %v930_v48 }
 0x13b   :  { %858 = vmatprep.subr.bf16.mxu1 %v1046_v0 }
 0x13e   :  { %859 = vmatpush3.bf16.msra.mxu1 %v931_v49 }
 0x13f   :  { %860 = vmatprep.subr.bf16.mxu1 %v1046_v0 }
 0x142   :  { %861 = vmatpush3.bf16.msra.mxu1 %v932_v50 }
 0x143   :  { %862 = vmatprep.subr.bf16.mxu1 %v1046_v0 }
 0x146   :  { %863 = vmatpush3.bf16.msra.mxu1 %v933_v51 }
 0x147   :  { %864 = vmatprep.subr.bf16.mxu1 %v1046_v0 }
 0x14a   :  { %865 = vmatpush3.bf16.msra.mxu1 %v934_v52 }
 0x14b   :  { %866 = vmatprep.subr.bf16.mxu1 %v1046_v0 }
 0x14e   :  { %867 = vmatpush3.bf16.msra.mxu1 %v935_v62 }
 0x14f   :  { %868 = vmatprep.subr.bf16.mxu1 %v1046_v0 }
 0x152   :  { %869 = vmatpush3.bf16.msra.mxu1 %v936_v63 }
 0x208   :  { %v310_v54 = vpop.f32.mrb[0].mxu1 }
 0x209   :  { %v311_v55 = vadd.f32 %v711_v53, %v310_v54  ;;  %v832_v56 = vpop.f32.mrb[1].mxu1 }
 0x20a   :  { %v313_v57 = vpop.f32.mrb[2].mxu1 }
 0x20b   :  { %v316_v58 = vmax.f32 %v311_v55, 0.0  ;;  %v833_v59 = vpop.f32.mrb[3].mxu1 }
 0x20d   :  { %v317_v60 = vadd.f32 %v316_v58, %v203_v43 }
 0x20f   :  { %v318_v61 = vpack.c.bf16 %v317_v60, %v317_v60 }
 0x211   :  { %851 = vmatmul.mubr.bf16.vlgmr.msra.gmra.mrb[4].mxu0 %v318_v61 }
 0x212   :  { %890 = vmatprep.mubr.msk.bf16.mxu0 %vm1047_vm0, %v1046_v0  ;;  %875 = vmatpush3.bf16.msra.mxu0 %v937_v1 }
 0x213   :  { %876 = vmatprep.subr.bf16.mxu0 %v1046_v0 }
 0x216   :  { %877 = vmatpush3.bf16.msra.mxu0 %v938_v2 }
 0x217   :  { %878 = vmatprep.subr.bf16.mxu0 %v1046_v0 }
 0x21a   :  { %879 = vmatpush3.bf16.msra.mxu0 %v939_v3 }
 0x21b   :  { %880 = vmatprep.subr.bf16.mxu0 %v1046_v0 }
 0x21e   :  { %881 = vmatpush3.bf16.msra.mxu0 %v940_v4 }
 0x21f   :  { %882 = vmatprep.subr.bf16.mxu0 %v1046_v0 }
 0x222   :  { %883 = vmatpush3.bf16.msra.mxu0 %v941_v5 }
 0x223   :  { %884 = vmatprep.subr.bf16.mxu0 %v1046_v0 }
 0x226   :  { %885 = vmatpush3.bf16.msra.mxu0 %v942_v7 }
 0x227   :  { %886 = vmatprep.subr.bf16.mxu0 %v1046_v0 }
 0x22a   :  { %887 = vmatpush3.bf16.msra.mxu0 %v943_v17 }
 0x22b   :  { %888 = vmatprep.subr.bf16.mxu0 %v1046_v0 }
 0x22e   :  { %889 = vmatpush3.bf16.msra.mxu0 %v944_v18 }
 0x2e4   :  { %v426_v9 = vpop.f32.mrb[4].mxu0 }
 0x2e5   :  { %v427_v10 = vadd.f32 %v721_v8, %v426_v9  ;;  %v852_v11 = vpop.f32.mrb[5].mxu0 }
 0x2e6   :  { %v429_v12 = vpop.f32.mrb[6].mxu0 }
 0x2e7   :  { %v432_v13 = vmax.f32 %v427_v10, 0.0  ;;  %v853_v14 = vpop.f32.mrb[7].mxu0 }
 0x2e9   :  { %v433_v15 = vadd.f32 %v432_v13, %v317_v60 }
 0x2eb   :  { %v434_v16 = vpack.c.bf16 %v433_v15, %v433_v15 }
 0x2ed   :  { %871 = vmatmul.mubr.bf16.vlgmr.msra.gmra.mrb[4].mxu1 %v434_v16 }
 0x3c0   :  { %v542_v25 = vpop.f32.mrb[4].mxu1 }
 0x3c1   :  { %v543_v26 = vadd.f32 %v731_v24, %v542_v25  ;;  %v872_v27 = vpop.f32.mrb[5].mxu1 }
 0x3c2   :  { %v545_v28 = vpop.f32.mrb[6].mxu1 }
 0x3c3   :  { %v548_v29 = vmax.f32 %v543_v26, 0.0  ;;  %v873_v30 = vpop.f32.mrb[7].mxu1 }
 0x3c5   :  { %v549_v31 = vadd.f32 %v548_v29, %v433_v15 }
 0x3c7   :  { %v550_v0 = vpack.c.bf16 %v549_v31, %v549_v31 }
 0x3c9   :  { %891 = vmatmul.mubr.bf16.vlgmr.msra.gmra.mrb[8].mxu0 %v550_v0 }
 0x49c   :  { %v656_v20 = vpop.f32.mrb[8].mxu0 }
 0x49d   :  { %v657_v34 = vadd.f32 %v740_v6, %v656_v20  ;;  %v892_v35 = vpop.f32.mrb[9].mxu0 }
 0x49e   :  { %v659_v36 = vpop.f32.mrb[10].mxu0 }
 0x49f   :  { %v682_v38 = vmul.f32 %v680_v33, %v657_v34  ;;  %v893_v39 = vpop.f32.mrb[11].mxu0 }
 0x4a1   :  { %v683_v40 = vadd.f32 %v682_v38, %v676_v37 }
 0x4a3   :  { %684 = vst [vmem:[#allocation8] sm:$0xff] %v683_v40 }
 0x4a4   :  { %1024 = shalt.err (!%p1021_p0)
}
 0x4a5   :  { %s1025_s17 = scalar_lea.hbm %s1262_s9, 128 }
 0x4a6   :  { %p1026_p1 = scmp.ne.s32.totalorder %s1262_s9, %s1025_s17  ;;  %p1029_p2 = scmp.lt.u32.totalorder %s1025_s17, %s1262_s9 }
 0x4a8   :  { %p1031_p3 = pnand %p1029_p2, %p1026_p1 }
 0x4aa   :  { %1034 = shalt.err (!%p1031_p3)
}
 0x4ab   :  { %694 = dma.vmem_to_hbm [thread:$0]  %s692_s14, 128, %s1262_s9, [#allocation4]  }
 0x4ac   :  { %1039 = dma.done.wait [#allocation4], 128  }
 0x4ad   :  { %1040 = vsyncadd [#allocation4], 4294967168 }
 0x4ae   :  { %698 = vsyncpa [#allocation3], 1 }
 0x4af   :  { %699 = vsyncpa [#allocation6], 1 }
 0x4b0   :  { %700 = vsyncpa [#allocation4], 1 }

</bundles_post_ra>
